<compile_context>
chip_gen: v6e
topology: v6e:2x2x1
jax: 0.10.0
libtpu: 0.0.40
codegen_flags: <defaults>
</compile_context>

<pallas_src>
import jax
import jax.numpy as jnp
from jax import lax
from jax.experimental import pallas as pl
from jax.experimental.pallas import tpu as pltpu

LN_EPS = 1e-12  # matches layer_norm_eps=1e-12 in the PyTorch module


def ape_kernel(x_ref, pos_ref, gamma_ref, beta_ref, o_ref):
    # x_ref/o_ref: (TILE_B, TILE_S, H); pos_ref: (TILE_S, H);
    # gamma_ref/beta_ref: (1, H) already f32.
    x = x_ref[...].astype(jnp.float32)
    pos = pos_ref[...].astype(jnp.float32)

    emb = x + pos[None]                                    # add position embeddings
    mean = jnp.mean(emb, axis=-1, keepdims=True)           # LayerNorm over H (f32)
    centered = emb - mean
    var = jnp.mean(centered * centered, axis=-1, keepdims=True)
    inv = lax.rsqrt(var + LN_EPS)                          # EUP rsqrt (free slot)
    normed = centered * inv

    # (1, H) broadcasts against (TILE_B, TILE_S, H) directly.
    out = normed * gamma_ref[...] + beta_ref[...]

    # TODO(synk): dropout is identity here (eval semantics); training-mode
    # stochastic dropout would use pltpu.prng_seed / pltpu.stateful_bernoulli.
    o_ref[...] = out.astype(o_ref.dtype)


def _sublane_pack(itemsize):
    # Rows per sublane group for the streamed dtype: 8 for 32-bit, 16 for
    # 16-bit (bf16), 32 for 8-bit (int8/fp8).
    return {4: 8, 2: 16, 1: 32}.get(itemsize, 8)


def _vmem_budget():
    """(streamed-buffer budget, vmem_limit_bytes) based on the chip's VMEM."""
    try:
        cap = pltpu.get_tpu_info().vmem_capacity_bytes
    except Exception:
        cap = 64 << 20  # be conservative (v7x-sized) if the query fails
    if cap >= (100 << 20):          # v5e / v6e: 128 MiB physical VMEM
        return 48 << 20, 96 << 20
    return 24 << 20, 48 << 20       # v7x: 64 MiB physical VMEM


def _pick_tiles(B, S, H, itemsize, budget_bytes):
    """Choose (TILE_B, TILE_S).

    Per streamed (batch, seq) row we account for:
      * x + out, each double-buffered:          4 * H * itemsize
      * pos, double-buffered (upper bound):     2 * H * itemsize
      * f32 compute temporaries (~3 live):     12 * H
    """
    pack = _sublane_pack(itemsize)
    per_row = 6 * H * itemsize + 12 * H
    max_rows = max(pack, budget_bytes // per_row)

    if S % pack == 0:
        tile_s = min(S, (max_rows // pack) * pack)
        while tile_s > pack and S % tile_s != 0:
            tile_s -= pack
        if S % tile_s != 0:
            tile_s = S
    else:
        # TODO(synk): irregular S falls back to a full-sequence block; for very
        # large S*H this can exceed the VMEM budget and would need a padded /
        # Element-style row tiling instead.
        tile_s = S

    tile_b = max(1, min(B, max_rows // max(tile_s, 1)))
    while tile_b > 1 and B % tile_b != 0:
        tile_b -= 1

    # Guarantee >= 2 grid steps so v7x's two TensorCores both get work.
    # Prefer splitting the seq axis so each core keeps its own pos-tile reuse.
    if (S // tile_s) * (B // tile_b) < 2:
        half_s = tile_s // 2
        if half_s >= pack and half_s % pack == 0 and S % half_s == 0:
            tile_s = half_s
        elif tile_b > 1:
            tile_b = tile_b // 2
            while tile_b > 1 and B % tile_b != 0:
                tile_b -= 1

    return tile_b, tile_s


def absolute_position_embedding(x, pos_emb, gamma, beta):
    """x: (B, S, H); pos_emb: (S, H); gamma/beta: (H,)"""
    B, S, H = x.shape
    # Cast the constant affine params once in the wrapper (no per-step casts).
    gamma2 = gamma.reshape(1, H).astype(jnp.float32)
    beta2 = beta.reshape(1, H).astype(jnp.float32)

    itemsize = jnp.dtype(x.dtype).itemsize
    budget_bytes, vmem_limit = _vmem_budget()
    tile_b, tile_s = _pick_tiles(B, S, H, itemsize, budget_bytes)
    s_tiles = S // tile_s
    b_tiles = B // tile_b

    # TODO(synk): for production H should be a multiple of 128 (lane-dense
    # stores); pad x/pos/gamma/beta in the caller and mask the mean/var, or
    # keep a full-H block as done here (legal but uses masked partial stores
    # when H < 128).

    cost = pl.CostEstimate(
        flops=8 * B * S * H,                 # add, sub, sq, mul-add chain per element
        transcendentals=B * S,               # one rsqrt per row
        bytes_accessed=(2 * B * S * H + S * H) * itemsize + 2 * H * 4,
    )

    return pl.pallas_call(
        ape_kernel,
        out_shape=jax.ShapeDtypeStruct((B, S, H), x.dtype),
        grid_spec=pltpu.PrefetchScalarGridSpec(
            num_scalar_prefetch=0,
            grid=(s_tiles, b_tiles),         # seq tiles outer, batch tiles inner
            in_specs=[
                # x: one (TILE_B, TILE_S, H) slab per (s, b).
                pl.BlockSpec((tile_b, tile_s, H), lambda s, b: (b, s, 0)),
                # pos: same block for every inner-b step -> DMA'd once per s tile.
                pl.BlockSpec((tile_s, H), lambda s, b: (s, 0)),
                pl.BlockSpec((1, H), lambda s, b: (0, 0)),   # gamma (f32)
                pl.BlockSpec((1, H), lambda s, b: (0, 0)),   # beta  (f32)
            ],
            out_specs=pl.BlockSpec((tile_b, tile_s, H), lambda s, b: (b, s, 0)),
        ),
        compiler_params=pltpu.CompilerParams(
            dimension_semantics=("parallel", "parallel"),
            vmem_limit_bytes=vmem_limit,
        ),
        cost_estimate=cost,
    )(x, pos_emb, gamma2, beta2)


def reference(x, pos_emb, gamma, beta):
    emb = x.astype(jnp.float32) + pos_emb.astype(jnp.float32)[None]
    mean = jnp.mean(emb, axis=-1, keepdims=True)
    var = jnp.mean((emb - mean) ** 2, axis=-1, keepdims=True)
    normed = (emb - mean) / jnp.sqrt(var + LN_EPS)
    return normed * gamma + beta


if __name__ == "__main__":
    B, S, H = 2, 8, 32   # batch, seq_len, input_size (small demo shapes)

    key = jax.random.PRNGKey(0)
    kx, kpos = jax.random.split(key)

    x = jax.random.normal(kx, (B, S, H), dtype=jnp.float32)
    # nn.Embedding default init: N(0, 1)
    pos_emb = jax.random.normal(kpos, (S, H), dtype=jnp.float32)
    # nn.LayerNorm default init: weight=1, bias=0
    gamma = jnp.ones((H,), dtype=jnp.float32)
    beta = jnp.zeros((H,), dtype=jnp.float32)

    out = absolute_position_embedding(x, pos_emb, gamma, beta)
    out = jax.block_until_ready(out)

    ref = reference(x, pos_emb, gamma, beta)
    assert out.shape == (B, S, H)
    assert jnp.allclose(out, ref, atol=1e-5, rtol=1e-5), "mismatch vs reference"

    print("KERNEL_OK")
</pallas_src>

<mosaic_0001>
module attributes {stable_mosaic.version = 11 : i64} {
  func.func @ape_kernel(%arg0: i32, %arg1: i32, %arg2: memref<1x8x32xf32, #tpu.memory_space<vmem>>, %arg3: memref<8x32xf32, #tpu.memory_space<vmem>>, %arg4: memref<1x32xf32, #tpu.memory_space<vmem>>, %arg5: memref<1x32xf32, #tpu.memory_space<vmem>>, %arg6: memref<1x8x32xf32, #tpu.memory_space<vmem>>) attributes {dimension_semantics = [#tpu.dimension_semantics<parallel>, #tpu.dimension_semantics<parallel>], iteration_bounds = array<i64: 1, 2>, scalar_prefetch = 0 : i64, scratch_operands = 0 : i64, tpu.core_type = #tpu.core_type<tc>, window_params = [{transform_indices = @transform_0, window_bounds = array<i64: 1, 8, 32>}, {transform_indices = @transform_1, window_bounds = array<i64: 8, 32>}, {pipeline_mode = #tpu.pipeline_mode<synchronous>, transform_indices = @transform_2, window_bounds = array<i64: 1, 32>}, {pipeline_mode = #tpu.pipeline_mode<synchronous>, transform_indices = @transform_3, window_bounds = array<i64: 1, 32>}, {transform_indices = @transform_4, window_bounds = array<i64: 1, 8, 32>}]} {
    %c0 = arith.constant 0 : index
    %c0_0 = arith.constant 0 : index
    %c0_1 = arith.constant 0 : index
    %0 = vector.load %arg2[%c0, %c0_0, %c0_1] : memref<1x8x32xf32, #tpu.memory_space<vmem>>, vector<1x8x32xf32>
    %c0_2 = arith.constant 0 : index
    %c0_3 = arith.constant 0 : index
    %1 = vector.load %arg3[%c0_2, %c0_3] : memref<8x32xf32, #tpu.memory_space<vmem>>, vector<8x32xf32>
    %2 = vector.shape_cast %1 : vector<8x32xf32> to vector<1x8x32xf32>
    %3 = arith.addf %0, %2 : vector<1x8x32xf32>
    %cst = arith.constant dense<0.000000e+00> : vector<1x8xf32>
    %4 = vector.multi_reduction <add>, %3, %cst [2] : vector<1x8x32xf32> to vector<1x8xf32>
    %5 = vector.shape_cast %4 : vector<1x8xf32> to vector<1x8x1xf32>
    %cst_4 = arith.constant 3.200000e+01 : f32
    %6 = vector.broadcast %cst_4 : f32 to vector<1x8x1xf32>
    %7 = arith.divf %5, %6 : vector<1x8x1xf32>
    %8 = vector.broadcast %7 : vector<1x8x1xf32> to vector<1x8x32xf32>
    %9 = arith.subf %3, %8 : vector<1x8x32xf32>
    %10 = arith.mulf %9, %9 : vector<1x8x32xf32>
    %cst_5 = arith.constant dense<0.000000e+00> : vector<1x8xf32>
    %11 = vector.multi_reduction <add>, %10, %cst_5 [2] : vector<1x8x32xf32> to vector<1x8xf32>
    %12 = vector.shape_cast %11 : vector<1x8xf32> to vector<1x8x1xf32>
    %cst_6 = arith.constant 3.200000e+01 : f32
    %13 = vector.broadcast %cst_6 : f32 to vector<1x8x1xf32>
    %14 = arith.divf %12, %13 : vector<1x8x1xf32>
    %cst_7 = arith.constant 9.99999996E-13 : f32
    %15 = vector.broadcast %cst_7 : f32 to vector<1x8x1xf32>
    %16 = arith.addf %14, %15 : vector<1x8x1xf32>
    %17 = math.rsqrt %16 : vector<1x8x1xf32>
    %18 = vector.broadcast %17 : vector<1x8x1xf32> to vector<1x8x32xf32>
    %19 = arith.mulf %9, %18 : vector<1x8x32xf32>
    %c0_8 = arith.constant 0 : index
    %c0_9 = arith.constant 0 : index
    %20 = vector.load %arg4[%c0_8, %c0_9] : memref<1x32xf32, #tpu.memory_space<vmem>>, vector<1x32xf32>
    %21 = vector.shape_cast %20 : vector<1x32xf32> to vector<1x1x32xf32>
    %22 = vector.broadcast %21 : vector<1x1x32xf32> to vector<1x8x32xf32>
    %23 = arith.mulf %19, %22 : vector<1x8x32xf32>
    %c0_10 = arith.constant 0 : index
    %c0_11 = arith.constant 0 : index
    %24 = vector.load %arg5[%c0_10, %c0_11] : memref<1x32xf32, #tpu.memory_space<vmem>>, vector<1x32xf32>
    %25 = vector.shape_cast %24 : vector<1x32xf32> to vector<1x1x32xf32>
    %26 = vector.broadcast %25 : vector<1x1x32xf32> to vector<1x8x32xf32>
    %27 = arith.addf %23, %26 : vector<1x8x32xf32>
    %c0_12 = arith.constant 0 : index
    %c0_13 = arith.constant 0 : index
    %c0_14 = arith.constant 0 : index
    %28 = vector.load %arg6[%c0_12, %c0_13, %c0_14] : memref<1x8x32xf32, #tpu.memory_space<vmem>>, vector<1x8x32xf32>
    tpu.vector_store %arg6[%c0_12, %c0_13, %c0_14], %27 {strides = array<i32>} : memref<1x8x32xf32, #tpu.memory_space<vmem>>, vector<1x8x32xf32>,
    return
  }
  func.func @transform_0(%arg0: i32, %arg1: i32) -> (i32, i32, i32) {
    %c0_i32 = arith.constant 0 : i32
    %c0_i32_0 = arith.constant 0 : i32
    return %arg1, %arg0, %c0_i32 : i32, i32, i32
  }
  func.func @transform_1(%arg0: i32, %arg1: i32) -> (i32, i32) {
    %c0_i32 = arith.constant 0 : i32
    %c0_i32_0 = arith.constant 0 : i32
    return %arg0, %c0_i32 : i32, i32
  }
  func.func @transform_2(%arg0: i32, %arg1: i32) -> (i32, i32) {
    %c0_i32 = arith.constant 0 : i32
    %c0_i32_0 = arith.constant 0 : i32
    %c0_i32_1 = arith.constant 0 : i32
    return %c0_i32, %c0_i32_0 : i32, i32
  }
  func.func @transform_3(%arg0: i32, %arg1: i32) -> (i32, i32) {
    %c0_i32 = arith.constant 0 : i32
    %c0_i32_0 = arith.constant 0 : i32
    %c0_i32_1 = arith.constant 0 : i32
    return %c0_i32, %c0_i32_0 : i32, i32
  }
  func.func @transform_4(%arg0: i32, %arg1: i32) -> (i32, i32, i32) {
    %c0_i32 = arith.constant 0 : i32
    %c0_i32_0 = arith.constant 0 : i32
    return %arg1, %arg0, %c0_i32 : i32, i32, i32
  }
}

</mosaic_0001>

<bundles_post_ra>
// kernel: tpu_custom_call.1
= control target key start
LH: loop header
LB: loop body
LE: loop exit
PB: predicated region body
PF: predicated region fallthrough
CT: control target
= control target key end

     0   :  { %9 = vsyncpa [#allocation3], 0  ;;  %s822_s0 = inlined_call_operand.hbm [shape: f32[2,8,32], index: 0, kind: input, shape index: {}]   ;;  %s823_s1 = inlined_call_operand.hbm [shape: f32[8,32], index: 1, kind: input, shape index: {}]   ;;  %s824_s2 = inlined_call_operand.vmem [shape: f32[1,32], index: 2, kind: input, shape index: {}]   ;;  %s825_s3 = inlined_call_operand.vmem [shape: f32[1,32], index: 3, kind: input, shape index: {}]   ;;  %s826_s4 = inlined_call_operand.hbm [shape: f32[2,8,32], index: 4, kind: output, shape index: {}]  }
   0x1   :  { %11 = vsyncpa [#allocation3 + $0x1], 0 }
   0x2   :  { %12 = vsyncpa [#allocation6], 0 }
   0x3   :  { %13 = vsyncpa [#allocation4], 0 }
   0x4   :  { %15 = vsyncpa [#allocation4 + $0x1], 0  ;;  %s652_s15 = smov 0   ;;  %s654_s16 = smov 0  }
   0x5   :  { %s656_s17 = smov 0   ;;  %s658_s18 = smov 0  }
   0x6   :  { %s660_s19 = smov 0   ;;  %s662_s20 = smov 0  }
   0x7 LB: > { %s392_s21 = sadd.s32 4294967295, %s622_s20   ;;  %s393_s22 = sadd.s32 4294967294, %s622_s20   ;;  %s622_s20 = sphi %s662_s20, %s21_s20   ;;  %s618_s19 = sphi %s660_s19, %s843_s19   ;;  %s614_s18 = sphi %s658_s18, %s842_s18   ;;  %s610_s17 = sphi %s656_s17, %s841_s17   ;;  %s606_s16 = sphi %s654_s16, %s840_s16   ;;  %s602_s15 = sphi %s652_s15, %s839_s15  }
   0x8   : > { %p55_p0 = scmp.ne.s32.totalorder %s606_s16, %s602_s15  ;;  %p686_p1 = scmp.eq.s32.totalorder %s392_s21, 0 }
   0x9   : > { %p690_p2 = scmp.eq.s32.totalorder %s392_s21, 1  ;;  %p155_p3 = scmp.eq.s32.totalorder %s393_s22, 1 }
   0xa   : > { %p696_p4 = por %p686_p1, %p55_p0  ;;  %p394_p5 = scmp.ge.s32.totalorder %s622_s20, 1 }
   0xb   : > { %p701_p6 = por %p155_p3, %p55_p0  ;;  %p162_p7 = scmp.lt.s32.totalorder %s622_s20, 3 }
   0xc   : > { %s830_s25 = scalar_select %p696_p4, 1, 0 }
   0xd   : > { %s831_s26 = scalar_select %p701_p6, 1, 0 }
   0xe   : > { %p706_p8 = pnand %p394_p5, %p162_p7  ;;  %s624_s28 = smov [#allocation5]  }
   0xf   : > { %s177_s29 = sshll.u32 %s624_s28, 4  ;;  %s30_s5 = sadd.s32 1, %s618_s19  ;;  %s178_s29 = int_to_ptr.vmem [resolvable:$true] %s177_s29 }
  0x10   : > { %p417_p10 = pneg %p706_p8  ;;  %s42_s6 = sadd.s32 1, %s610_s17 }
  0x11   : > { %p31_p12 = scmp.ge.s32.totalorder %s30_s5, 2  ;;  %s495_s7 = scalar_lea.vmem %s178_s29, 128 }
  0x12   : > { %p715_p11 = pnand %p417_p10, %p686_p1  ;;  %p496_p0 = scmp.ne.s32.totalorder %s178_s29, %s495_s7 }
  0x13   : > { %p503_p7 = scmp.lt.s32.totalorder %s178_s29, %s178_s29  ;;  %p504_p6 = scmp.lt.s32.totalorder %s495_s7, %s495_s7 }
  0x14   : > { %p486_p13 = pneg %p715_p11 }
  0x15   : > { %p505_p9 = por %p504_p6, %p503_p7 }
  0x16   : > { %p498_p3 = pnand %p496_p0, %p486_p13 }
  0x18   : > { %p499_p5 = pneg %p498_p3 }
  0x1a   : > { %p506_p4 = pnand %p505_p9, %p499_p5 }
  0x1c   : > { %509 = shalt.err (!%p506_p4)
}
  0x1d   : > { %420 = dma.hbm_to_vmem [thread:$0]  (!%p715_p11), %s823_s1, 128, %s178_s29, [#allocation6]  }
  0x1e   : > { %s845_s5 = smov (%p31_p12, %s30_s5), 0  ;;  %p49_p6 = scmp.ne.s32.totalorder %s610_s17, %s606_s16 }
  0x1f   : > { %p50_p4 = scmp.eq.s32.totalorder %s622_s20, 0  ;;  %s37_s10 = ssub.s32 %s618_s19, %s845_s5 }
  0x20   : > { %p430_p9 = scmp.lt.s32.totalorder %s622_s20, 2  ;;  %p40_p10 = scmp.eq.s32.totalorder %s37_s10, 0 }
  0x21   : > { %p51_p13 = por %p50_p4, %p49_p6  ;;  %p738_p0 = por %p690_p2, %p49_p6 }
  0x22   : > { %s194_s12 = sand.u32 1, %s610_s17   ;;  %s398_s21 = sshll.u32 %s618_s19, 7 }
  0x23   : > { %s744_s13 = scalar_select %p40_p10, %s610_s17, %s42_s6  }
  0x24   : > { %s397_s14 = sshll.u32 %s194_s12, 3  ;;  %s204_s29 = scalar_lea.hbm %s822_s0, %s398_s21 }
  0x25   : > { %s198_s30 = scalar_lea.vmem [#allocation2], %s397_s14  ;;  %p750_p11 = pnand %p430_p9, %p51_p13 }
  0x26   : > { %s206_s7 = sshll.u32 %s198_s30, 4  ;;  %s195_s24 = scalar_lea.sflag [#allocation3], %s194_s12  ;;  %s207_s7 = int_to_ptr.vmem [resolvable:$true] %s206_s7 }
  0x27   : > { %p512_p2 = pneg %p750_p11  ;;  %s523_s9 = scalar_lea.vmem %s207_s7, 128 }
  0x28   : > { %p524_p12 = scmp.ne.s32.totalorder %s207_s7, %s523_s9  ;;  %s625_s6 = smov [#allocation2]  }
  0x29   : > { %s528_s10 = sshll.u32 %s625_s6, 4  ;;  %s529_s10 = int_to_ptr.vmem [resolvable:$false] %s528_s10 }
  0x2a   : > { %p526_p3 = pnand %p524_p12, %p512_p2  ;;  %s530_s22 = scalar_lea.vmem %s529_s10, 256 }
  0x2b   : > { %p531_p7 = scmp.lt.s32.totalorder %s207_s7, %s529_s10  ;;  %p532_p6 = scmp.lt.s32.totalorder %s530_s22, %s523_s9 }
  0x2c   : > { %p527_p5 = pneg %p526_p3 }
  0x2d   : > { %p533_p4 = por %p532_p6, %p531_p7 }
  0x2f   : > { %p534_p10 = pnand %p533_p4, %p527_p5 }
  0x31   : > { %537 = shalt.err (!%p534_p10)
}
  0x32   : > { %424 = dma.hbm_to_vmem [thread:$0]  (!%p750_p11), %s204_s29, 128, %s207_s7, %s195_s24  }
  0x33   : > { %215 = sbr.rel (%p706_p8) target bundleno = 383 (0x17f), region = 36  ;;  %s761_s12 = sand.u32 (!%p706_p8), 1, %s606_s16  }
  0x34   : > { %s400_s14 = sshll.u32 (!%p706_p8), %s761_s12, 3  ;;  %s218_s21 = scalar_lea.sflag (!%p706_p8), [#allocation3], %s761_s12 }
  0x35   : > { %s221_s28 = scalar_lea.vmem (!%p706_p8), [#allocation2], %s400_s14  ;;  %p836_p9 = scmp.ne.s32.totalorder (!%p706_p8), %s830_s25, 0 }
  0x38   : > { %589 = dma.done.wait (%p836_p9), %s218_s21, 128  }
  0x39   : > { %591 = vsyncadd (%p836_p9), %s218_s21, 4294967168 }
  0x3a   : > { %593 = dma.done.wait (%p686_p1), [#allocation6], 128  }
  0x3b   : > { %595 = vsyncadd (%p686_p1), [#allocation6], 4294967168  ;;  %v250_v0 = vld [vmem:[%s221_s28] sm:$0xff]  ;;  %v251_v1 = vld [vmem:[#allocation5] sm:$0xff]  ;;  %vm253_vm0 = vcmask 261120   ;;  %s406_s30 = sshll.u32 %s614_s18, 7 }
  0x3c   : > { %v252_v2 = vadd.f32 %v251_v1, %v250_v0  ;;  %v403_v13 = vld [vmem:[%s824_s2] ss:$0 sm:$0xff]  ;;  %s249_s7 = scalar_lea.vmem [#allocation7], %s400_s14  ;;  %s298_s6 = scalar_lea.hbm %s826_s4, %s406_s30 }
  0x3d   : > { %v404_v15 = vld [vmem:[%s825_s3] ss:$0 sm:$0xff]  ;;  %s300_s8 = sshll.u32 %s249_s7, 4  ;;  %s286_s10 = scalar_lea.sflag [#allocation4], %s761_s12  ;;  %s301_s8 = int_to_ptr.vmem [resolvable:$true] %s300_s8 }
  0x3e   : > { %v254_v3 = vsel %vm253_vm0, %v252_v2, 0.0  ;;  %s538_s22 = scalar_lea.vmem %s301_s8, 128  ;;  %s626_s21 = smov [#allocation7]  }
  0x3f   : > { %255 = vadd.xlane.f32.xlu0 %v254_v3  ;;  %p539_p1 = scmp.ne.s32.totalorder %s301_s8, %s538_s22  ;;  %s542_s28 = sshll.u32 %s626_s21, 4  ;;  %s543_s28 = int_to_ptr.vmem [resolvable:$false] %s542_s28 }
  0x40   : > { %s544_s18 = scalar_lea.vmem %s543_s28, 256  ;;  %p545_p11 = scmp.lt.s32.totalorder %s301_s8, %s543_s28 }
  0x41   : > { %p540_p8 = pnand %p539_p1, %p738_p0  ;;  %p546_p2 = scmp.lt.s32.totalorder %s544_s18, %s538_s22 }
  0x43   : > { %p541_p13 = pneg %p540_p8  ;;  %p547_p12 = por %p546_p2, %p545_p11 }
  0x45   : > { %p548_p3 = pnand %p547_p12, %p541_p13 }
  0xc8   : > { %v256_v4 = vpop.xlane.xlu0 %255 }
  0xc9   : > { %v258_v5 = vmul.f32 0.03125, %v256_v4 }
  0xcb   : > { %v259_v6 = vsub.f32 %v252_v2, %v258_v5 }
  0xcd   : > { %v260_v7 = vmul.f32 %v259_v6, %v259_v6 }
  0xcf   : > { %v261_v8 = vsel %vm253_vm0, %v260_v7, 0.0 }
  0xd0   : > { %262 = vadd.xlane.f32.xlu0 %v261_v8 }
 0x159   : > { %v263_v9 = vpop.xlane.xlu0 %262 }
 0x15a   : > { %v264_v10 = vmul.f32 0.03125, %v263_v9 }
 0x15c   : > { %v265_v11 = vadd.f32 1e-12, %v264_v10 }
 0x15e   : > { %482 = vrsqrt.f32 %v265_v11 }
 0x16b   : > { %v483_v12 = vpop.eup %482 }
 0x16c   : > { %v267_v14 = vmul.f32 %v483_v12, %v259_v6 }
 0x16e   : > { %v275_v16 = vmul.f32 %v403_v13, %v267_v14 }
 0x170   : > { %v283_v17 = vadd.f32 %v404_v15, %v275_v16 }
 0x172   : > { %284 = vst.msk [vmem:[%s249_s7] sm:$0xff] %vm253_vm0, %v283_v17 }
 0x173   : > { %551 = shalt.err (!%p548_p3)
}
 0x174   : > { %s552_s14 = scalar_lea.hbm %s298_s6, 128  ;;  %s556_s25 = scalar_lea.hbm %s826_s4, 256 }
 0x175   : > { %p553_p5 = scmp.ne.s32.totalorder %s298_s6, %s552_s14  ;;  %p557_p4 = scmp.lt.s32.totalorder %s298_s6, %s826_s4 }
 0x176   : > { %p558_p10 = scmp.lt.s32.totalorder %s556_s25, %s552_s14 }
 0x177   : > { %p554_p7 = pnand %p553_p5, %p738_p0 }
 0x178   : > { %p559_p9 = por %p558_p10, %p557_p4 }
 0x179   : > { %p555_p6 = pneg %p554_p7 }
 0x17b   : > { %p560_p1 = pnand %p559_p9, %p555_p6 }
 0x17d   : > { %563 = shalt.err (!%p560_p1)
}
 0x17e   : > { %415 = dma.vmem_to_hbm [thread:$0]  (%p738_p0), %s301_s8, 128, %s298_s6, %s286_s10  }
 0x17f PF: > { %s312_s30 = sand.u32 1, %s602_s15   ;;  %p837_p8 = scmp.ne.s32.totalorder %s831_s26, 0 }
 0x180   : > { %p838_p13 = scmp.ge.s32.totalorder %s622_s20, 2  ;;  %s313_s7 = scalar_lea.sflag [#allocation4], %s312_s30 }
 0x182   : > { %p426_p11 = pnand %p838_p13, %p837_p8 }
 0x184   : > { %p427_p2 = pneg %p426_p11 }
 0x186   : > { %597 = dma.done.wait (%p427_p2), %s313_s7, 128  }
 0x187   : > { %599 = vsyncadd (%p427_p2), %s313_s7, 4294967168  ;;  %s21_s20 = sadd.s32 1, %s622_s20   ;;  %s839_s15 = smov %s606_s16 }
 0x188   : > { %p18_p12 = scmp.ge.s32.totalorder %s21_s20, 4   ;;  %s840_s16 = smov %s610_s17 }
 0x189   : > { %s841_s17 = smov %s744_s13  ;;  %s842_s18 = smov %s618_s19 }
 0x18a   : > { %s843_s19 = smov %s845_s5  ;;  %20 = sbr.rel (!%p18_p12) target bundleno = 7 (0x7), region = 86 }
 0x18f   :  { %318 = vsyncpa [#allocation3], 1 }
 0x190   :  { %320 = vsyncpa [#allocation3 + $0x1], 1 }
 0x191   :  { %321 = vsyncpa [#allocation6], 1 }
 0x192   :  { %322 = vsyncpa [#allocation4], 1 }
 0x193   :  { %324 = vsyncpa [#allocation4 + $0x1], 1 }

</bundles_post_ra>
